<compile_context>
chip_gen: v7x
topology: tpu7x:2x2x1
jax: 0.10.0
libtpu: 0.0.40
codegen_flags: <defaults>
</compile_context>

<pallas_src>
import jax
import jax.numpy as jnp
from jax.experimental import pallas as pl
from jax.experimental.pallas import tpu as pltpu


def _diag_gaussian_mean_kernel(x_ref, w_ref, b_ref, mean_ref):
    # action_mean = x @ W + b.
    # x tile arrives in f32 straight from HBM (no wrapper-side cast/pad pass);
    # the cast to the MXU operand dtype (bf16 by default) is a free VPU op
    # hidden under the tile DMA. Accumulation is f32; bias is added in f32.
    x = x_ref[...].astype(w_ref.dtype)
    mean_ref[...] = (
        jnp.dot(x, w_ref[...], preferred_element_type=jnp.float32) + b_ref[...]
    )


def diag_gaussian_forward(x, w_t, b, logstd, *, tb=None, use_bf16_mxu=True):
    """DiagGaussian forward.

    Args:
      x:      [B, num_inputs] float32 activations.
      w_t:    [num_inputs, num_outputs] float32 (fc_mean.weight transposed).
      b:      [num_outputs] float32 (fc_mean.bias).
      logstd: [num_outputs] float32 (AddBias parameter).
      tb:     optional batch tile (rows). Default: big tiles (up to 1024) for
              large batches, single sublane-aligned tile for small batches.
      use_bf16_mxu: bf16 MXU operands with f32 accumulation (default). Set
              False for an f32 path that tracks PyTorch's f32 Linear exactly
              (relevant if stored PPO log_probs must be bit-reproducible).

    Returns:
      (mean [B, num_outputs] f32, std [num_outputs] f32) -- the FixedNormal
      parameters. std is batch-independent (exp of the logstd parameter), so it
      is NOT broadcast to [B, N]; consumers broadcast lazily.
    """
    B, K = x.shape
    N = w_t.shape[1]

    # Batch tile: this head is HBM-bound, so use large tiles to amortize the
    # per-grid-step overhead; keep >=2 tiles for big batches (feeds both v7x
    # TensorCores) and stay comfortably inside the v5e 16 MiB scoped-VMEM
    # default even for K up to ~1024.
    if tb is None:
        tb = 1024 if B >= 2048 else ((B + 7) // 8) * 8
    tb = int(tb)
    tb = max(8, min(tb, 4096))
    tb = ((tb + 7) // 8) * 8
    grid_b = pl.cdiv(B, tb)

    mxu_dtype = jnp.bfloat16 if use_bf16_mxu else jnp.float32
    # Parameter-only (O(K*N)) casts/reshapes: negligible, done once outside the
    # per-row hot path. W and bias stay VMEM-resident across the whole grid.
    w_k = w_t.astype(mxu_dtype)
    b_k = b.reshape(1, N).astype(jnp.float32)

    # Only raise the scoped-VMEM limit if the double-buffered footprint would
    # exceed the v5e default (16 MiB); with the default tb caps it never does.
    x_bytes = 2 * tb * K * jnp.dtype(x.dtype).itemsize        # double-buffered x tile
    w_bytes = 2 * K * N * jnp.dtype(mxu_dtype).itemsize       # W (grid-invariant)
    o_bytes = 2 * tb * N * 4                                  # double-buffered out tile
    vmem_need = x_bytes + w_bytes + o_bytes + (1 << 20)
    cp_kwargs = dict(dimension_semantics=("parallel",))
    if vmem_need > (14 << 20):
        cp_kwargs["vmem_limit_bytes"] = int(min(2 * vmem_need, 64 << 20))

    cost = pl.CostEstimate(
        flops=2 * B * K * N,
        transcendentals=0,
        bytes_accessed=(B * K * jnp.dtype(x.dtype).itemsize
                        + K * N * jnp.dtype(mxu_dtype).itemsize
                        + B * N * 4),
    )

    mean = pl.pallas_call(
        _diag_gaussian_mean_kernel,
        out_shape=jax.ShapeDtypeStruct((B, N), jnp.float32),
        grid_spec=pl.GridSpec(
            grid=(grid_b,),
            in_specs=[
                pl.BlockSpec((tb, K), lambda i: (i, 0)),   # x tile (batch-tiled, f32)
                pl.BlockSpec((K, N), lambda i: (0, 0)),    # W: resident across grid
                pl.BlockSpec((1, N), lambda i: (0, 0)),    # bias: resident across grid
            ],
            # Narrow writeback: last dim == full array dim N (no 128-lane f32 pad).
            out_specs=pl.BlockSpec((tb, N), lambda i: (i, 0)),
        ),
        compiler_params=pltpu.CompilerParams(**cp_kwargs),
        cost_estimate=cost,
    )(x, w_k, b_k)

    # action_logstd = AddBias(zeros) == logstd parameter; scale = exp(logstd).
    # Batch-independent, so return [N] and let consumers broadcast (avoids a
    # [B, N] f32 HBM write + re-read of a constant-per-column value).
    std = jnp.exp(logstd.astype(jnp.float32))
    return mean, std


# ---- FixedNormal-style helpers (glue, plain JAX; kernel did the hot path) ----
def mode(mean):
    return mean                                              # Normal mode == mean


def log_probs(mean, std, actions):
    # Normal log_prob summed over the action dim, keepdim (FixedNormal.log_probs).
    # std has shape [N] and broadcasts against [B, N] lazily.
    var = std * std
    lp = (-((actions - mean) ** 2) / (2.0 * var)
          - jnp.log(std)
          - 0.5 * jnp.log(2.0 * jnp.pi))
    return lp.sum(-1, keepdims=True)


def entropy(std, batch=None):
    e = (0.5 + 0.5 * jnp.log(2.0 * jnp.pi) + jnp.log(std)).sum(-1)
    if batch is not None:
        e = jnp.broadcast_to(e, (batch,))
    return e


def _orthogonal_init(key, rows, cols, gain):
    # Mirrors nn.init.orthogonal_ semantics via QR decomposition.
    flat = jax.random.normal(key, (max(rows, cols), min(rows, cols)), jnp.float32)
    q, r = jnp.linalg.qr(flat)
    q = q * jnp.sign(jnp.diag(r))
    q = q[: max(rows, cols), : min(rows, cols)]
    if rows < cols:
        q = q.T
    return gain * q[:rows, :cols]


if __name__ == "__main__":
    key = jax.random.PRNGKey(0)
    k_x, k_w = jax.random.split(key)

    B = 16            # batch (small demo; wrapper scales to rollout-sized batches)
    NUM_INPUTS = 32   # hidden size feeding the head
    NUM_OUTPUTS = 6   # continuous action dimension

    # Parameters exactly as the module's init_: orthogonal weight (default gain=1),
    # zero bias, zero logstd.
    w_torch_layout = _orthogonal_init(k_w, NUM_OUTPUTS, NUM_INPUTS, gain=1.0)  # [out, in]
    w_t = jnp.asarray(w_torch_layout.T, jnp.float32)                            # [in, out]
    b = jnp.zeros((NUM_OUTPUTS,), jnp.float32)
    logstd = jnp.zeros((NUM_OUTPUTS,), jnp.float32)

    x = jax.random.normal(k_x, (B, NUM_INPUTS), jnp.float32)

    # Default tiling (single tile for this small batch) ...
    mean, std = diag_gaussian_forward(x, w_t, b, logstd)
    # ... and an explicit small tile to exercise the multi-step grid pipeline.
    mean_tiled, _ = diag_gaussian_forward(x, w_t, b, logstd, tb=8)  # 2 grid steps
    jax.block_until_ready((mean, mean_tiled, std))

    # Sanity checks against plain-JAX references.
    mean_ref_bf16 = jnp.dot(x.astype(jnp.bfloat16), w_t.astype(jnp.bfloat16),
                            preferred_element_type=jnp.float32) + b.reshape(1, -1)
    mean_ref_f32 = x @ w_t + b.reshape(1, -1)
    std_ref = jnp.exp(logstd)

    assert mean.shape == (B, NUM_OUTPUTS) and std.shape == (NUM_OUTPUTS,)
    assert jnp.allclose(mean, mean_ref_bf16, atol=1e-3), "mismatch vs bf16-matched reference"
    assert jnp.allclose(mean, mean_ref_f32, atol=5e-2), "mismatch vs f32 reference"
    assert jnp.allclose(mean_tiled, mean, atol=1e-6), "tiled grid mismatch"
    assert jnp.allclose(std, std_ref, atol=1e-6)

    # Exercise the FixedNormal-style helpers (std broadcasts lazily).
    _ = mode(mean)
    _ = log_probs(mean, std, jnp.zeros_like(mean))
    _ = entropy(std, batch=B)

    print("KERNEL_OK")
</pallas_src>

<mosaic_0001>
module attributes {stable_mosaic.version = 11 : i64} {
  func.func @_diag_gaussian_mean_kernel(%arg0: i32, %arg1: memref<16x32xf32, #tpu.memory_space<vmem>>, %arg2: memref<32x6xbf16, #tpu.memory_space<vmem>>, %arg3: memref<1x6xf32, #tpu.memory_space<vmem>>, %arg4: memref<16x6xf32, #tpu.memory_space<vmem>>) attributes {dimension_semantics = [#tpu.dimension_semantics<parallel>], iteration_bounds = array<i64: 1>, scalar_prefetch = 0 : i64, scratch_operands = 0 : i64, tpu.core_type = #tpu.core_type<tc>, window_params = [{transform_indices = @transform_0, window_bounds = array<i64: 16, 32>}, {pipeline_mode = #tpu.pipeline_mode<synchronous>, transform_indices = @transform_1, window_bounds = array<i64: 32, 6>}, {pipeline_mode = #tpu.pipeline_mode<synchronous>, transform_indices = @transform_2, window_bounds = array<i64: 1, 6>}, {transform_indices = @transform_3, window_bounds = array<i64: 16, 6>}]} {
    %c0 = arith.constant 0 : index
    %c0_0 = arith.constant 0 : index
    %0 = vector.load %arg1[%c0, %c0_0] : memref<16x32xf32, #tpu.memory_space<vmem>>, vector<16x32xf32>
    %1 = arith.truncf %0 : vector<16x32xf32> to vector<16x32xbf16>
    %c0_1 = arith.constant 0 : index
    %c0_2 = arith.constant 0 : index
    %2 = vector.load %arg2[%c0_1, %c0_2] : memref<32x6xbf16, #tpu.memory_space<vmem>>, vector<32x6xbf16>
    %cst = arith.constant dense<0.000000e+00> : vector<16x6xf32>
    %3 = tpu.matmul %1, %2, %cst {dimension_numbers = #tpu.dot_dimension_numbers<[1], [0], [0], [1], [0, 0, 1, 1], [], []>} : vector<16x32xbf16>, vector<32x6xbf16>, vector<16x6xf32> -> vector<16x6xf32>
    %c0_3 = arith.constant 0 : index
    %c0_4 = arith.constant 0 : index
    %4 = vector.load %arg3[%c0_3, %c0_4] : memref<1x6xf32, #tpu.memory_space<vmem>>, vector<1x6xf32>
    %5 = vector.broadcast %4 : vector<1x6xf32> to vector<16x6xf32>
    %6 = arith.addf %3, %5 : vector<16x6xf32>
    %c0_5 = arith.constant 0 : index
    %c0_6 = arith.constant 0 : index
    %7 = vector.load %arg4[%c0_5, %c0_6] : memref<16x6xf32, #tpu.memory_space<vmem>>, vector<16x6xf32>
    tpu.vector_store %arg4[%c0_5, %c0_6], %6 {strides = array<i32>} : memref<16x6xf32, #tpu.memory_space<vmem>>, vector<16x6xf32>,
    return
  }
  func.func @transform_0(%arg0: i32) -> (i32, i32) {
    %c0_i32 = arith.constant 0 : i32
    %c0_i32_0 = arith.constant 0 : i32
    return %arg0, %c0_i32 : i32, i32
  }
  func.func @transform_1(%arg0: i32) -> (i32, i32) {
    %c0_i32 = arith.constant 0 : i32
    %c0_i32_0 = arith.constant 0 : i32
    %c0_i32_1 = arith.constant 0 : i32
    return %c0_i32, %c0_i32_0 : i32, i32
  }
  func.func @transform_2(%arg0: i32) -> (i32, i32) {
    %c0_i32 = arith.constant 0 : i32
    %c0_i32_0 = arith.constant 0 : i32
    %c0_i32_1 = arith.constant 0 : i32
    return %c0_i32, %c0_i32_0 : i32, i32
  }
  func.func @transform_3(%arg0: i32) -> (i32, i32) {
    %c0_i32 = arith.constant 0 : i32
    %c0_i32_0 = arith.constant 0 : i32
    return %arg0, %c0_i32 : i32, i32
  }
}

</mosaic_0001>

<bundles_post_ra>
// kernel: tpu_custom_call.1
= control target key start
LH: loop header
LB: loop body
LE: loop exit
PB: predicated region body
PF: predicated region fallthrough
CT: control target
= control target key end

     0   :  { %v112_v0 = vmov 0.0   ;;  %vm113_vm0 = vmmov 0   ;;  %vm41_vm1 = vcmask 261120   ;;  %vm86_vm2 = vcmask 48128   ;;  %s155_s1 = inlined_call_operand.vmem [shape: bf16[32,6], index: 1, kind: input, shape index: {}]   ;;  %s156_s0 = inlined_call_operand.vmem [shape: f32[16,32], index: 0, kind: input, shape index: {}]   ;;  %s157_s2 = inlined_call_operand.vmem [shape: f32[1,6], index: 2, kind: input, shape index: {}]   ;;  %s158_s3 = inlined_call_operand.vmem [shape: f32[16,6], index: 3, kind: output, shape index: {}]  }
   0x1   :  { %100 = vmatprep.subr.bf16.mxu0 %v112_v0  ;;  %v110_v1 = vld [vmem:[%s155_s1] sm:$0xff]   ;;  %104 = vmatprep.mubr.msk.bf16.mxu0 %vm113_vm0, %v112_v0  ;;  %v111_v2 = vld [vmem:[%s155_s1 + $0x8] sm:$0xff]  }
   0x2   :  { %101 = vmatpush3.bf16.msra.mxu0 %v110_v1  ;;  %v15_v3 = vld [vmem:[%s156_s0] sm:$0xff]  ;;  %v16_v4 = vld [vmem:[%s156_s0 + $0x8] sm:$0xff] }
   0x3   :  { %102 = vmatprep.subr.bf16.mxu0 %v112_v0  ;;  %v17_v5 = vpack.c.bf16 %v16_v4, %v15_v3  ;;  %v93_v6 = vld [vmem:[%s157_s2] ss:$0 sm:$0xff] }
   0x6   :  { %103 = vmatpush3.bf16.msra.mxu0 %v111_v2 }
   0x9   :  { %105 = vmatmul.mubr.msk.bf16.vlgmr.msra.gmra.mrb[0].mxu0 %vm41_vm1, %v17_v5 }
  0xdc   :  { %v79_v7 = vpop.f32.mrb[0].mxu0 }
  0xdd   :  { %v80_v8 = vadd.f32 %v93_v6, %v79_v7  ;;  %v106_v9 = vpop.f32.mrb[1].mxu0 }
  0xde   :  { %v82_v10 = vpop.f32.mrb[2].mxu0 }
  0xdf   :  { %87 = vst.msk [vmem:[%s158_s3] sm:$0xff] %vm86_vm2, %v80_v8  ;;  %v83_v11 = vadd.f32 %v93_v6, %v82_v10  ;;  %v107_v12 = vpop.f32.mrb[3].mxu0 }
  0xe1   :  { %88 = vst.msk [vmem:[%s158_s3 + $0x8] sm:$0xff] %vm86_vm2, %v83_v11 }

</bundles_post_ra>
